<compile_context>
chip_gen: v6e
topology: v6e:2x2x1
jax: 0.10.0
libtpu: 0.0.40
codegen_flags: <defaults>
</compile_context>

<pallas_src>
import functools

import jax
import jax.numpy as jnp
from jax.experimental import pallas as pl
from jax.experimental.pallas import tpu as pltpu

DIM = 32            # HP.EMBED_SIZE
ARIT = 2
HIDDEN = 2 * DIM
LN_EPS = 1e-5
INV_DIM = 1.0 / DIM

TREES_PER_BLOCK = 8  # sublane batch: 8 trees per grid step (one f32 vreg sublane field)


def _pair_mlp_ln(xe, xo, w1e, w1o, b1, w2, b2, gamma, beta):
    """Linear(2*DIM->HIDDEN) -> ReLU -> Linear(HIDDEN->DIM) -> LayerNorm(DIM).

    xe / xo are the left / right element of each pair, (M, DIM) f32.
    cat([xe, xo], -1) @ W1 == xe @ W1[:DIM] + xo @ W1[DIM:]  (no pair-concat shuffle).
    Matmul inputs are bf16 (single MXU pass); accumulation + elementwise math stay f32.
    """
    h = (jnp.dot(xe.astype(jnp.bfloat16), w1e, preferred_element_type=jnp.float32)
         + jnp.dot(xo.astype(jnp.bfloat16), w1o, preferred_element_type=jnp.float32)
         + b1)
    h = jnp.maximum(h, 0.0)                                       # ReLU nonlin
    y = jnp.dot(h.astype(jnp.bfloat16), w2, preferred_element_type=jnp.float32) + b2
    # One-pass LayerNorm over the feature (lane) axis.
    s1 = jnp.sum(y, axis=-1, keepdims=True)
    s2 = jnp.sum(y * y, axis=-1, keepdims=True)
    mean = s1 * INV_DIM
    var = s2 * INV_DIM - mean * mean
    return (y - mean) * jax.lax.rsqrt(var + LN_EPS) * gamma + beta


# ----------------------------------------------------------------------------- single tree
def _tree_fold_kernel(n_leaves, x_ref, w1_ref, w2_ref, p_ref, o_ref, buf):
    """Whole binary-tree fold of one tree; `buf` is the PyTorch `full_sized` buffer in VMEM."""
    # Hoist all parameter loads / static slices out of the level loop (loaded once).
    w1e = w1_ref[0:DIM, :]            # (DIM, HIDDEN) bf16
    w1o = w1_ref[DIM:2 * DIM, :]      # (DIM, HIDDEN) bf16
    w2 = w2_ref[...]                  # (HIDDEN, DIM) bf16
    b1 = p_ref[0:1, :]                # (1, HIDDEN) f32
    b2 = p_ref[1:2, 0:DIM]            # (1, DIM)    f32
    gamma = p_ref[2:3, 0:DIM]
    beta = p_ref[3:4, 0:DIM]

    buf[0:n_leaves, :] = x_ref[...]   # seed with the leaf embeddings

    length, start = n_leaves, 0
    while length > 1:                 # static unroll: n_leaves is a trace-time shape
        n = length // 2
        fill_start = start + length
        if n == 1:
            xe = buf[pl.ds(start, 1), :]
            xo = buf[pl.ds(start + 1, 1), :]
        else:
            xe = buf[pl.ds(start, n, stride=2), :]       # left element of each pair
            xo = buf[pl.ds(start + 1, n, stride=2), :]   # right element of each pair
        buf[pl.ds(fill_start, n), :] = _pair_mlp_ln(
            xe, xo, w1e, w1o, b1, w2, b2, gamma, beta)
        start += 2 * n                # odd leftover stays in place and leads the next level
        length = (length + 1) // 2

    o_ref[...] = buf[pl.ds(start, 1), :]   # only the root embedding ever leaves VMEM


def tree_fold_pallas(x, w1_bf, w2_bf, packed):
    """Single tree: whole fold in one grid-less pallas_call (working set < 100 KB)."""
    n_leaves = x.shape[0]
    buf_rows = max(8, -(-(2 * n_leaves - 1) // 8) * 8)
    vmem = pl.BlockSpec(memory_space=pltpu.MemorySpace.VMEM)
    return pl.pallas_call(
        functools.partial(_tree_fold_kernel, n_leaves),
        out_shape=jax.ShapeDtypeStruct((1, DIM), jnp.float32),
        in_specs=[vmem] * 4,
        out_specs=vmem,
        scratch_shapes=[pltpu.VMEM((buf_rows, DIM), jnp.float32)],
    )(x, w1_bf, w2_bf, packed)


# ----------------------------------------------------------------------------- batched trees
def _tree_fold_batched_kernel(n_leaves, tb, x_ref, w1_ref, w2_ref, p_ref, o_ref, buf):
    """Tree fold for `tb` independent trees stacked along the sublane (row) axis.

    Buffer layout: element-major / tree-minor -> row = element_index * tb + tree.
    Every level does one contiguous (n*tb, DIM) store; even/odd pair elements are
    gathered as tb-row (slab-aligned) loads and concatenated along sublanes.
    """
    w1e = w1_ref[0:DIM, :]
    w1o = w1_ref[DIM:2 * DIM, :]
    w2 = w2_ref[...]
    b1 = p_ref[0:1, :]
    b2 = p_ref[1:2, 0:DIM]
    gamma = p_ref[2:3, 0:DIM]
    beta = p_ref[3:4, 0:DIM]

    buf[0:n_leaves * tb, :] = x_ref[...]    # seed: leaves of this block of tb trees

    length, start = n_leaves, 0
    while length > 1:                       # static unroll
        n = length // 2
        fill_start = start + length
        if n == 1:
            xe = buf[pl.ds(start * tb, tb), :]
            xo = buf[pl.ds((start + 1) * tb, tb), :]
        else:
            xe = jnp.concatenate(
                [buf[pl.ds((start + 2 * j) * tb, tb), :] for j in range(n)], axis=0)
            xo = jnp.concatenate(
                [buf[pl.ds((start + 2 * j + 1) * tb, tb), :] for j in range(n)], axis=0)
        y = _pair_mlp_ln(xe, xo, w1e, w1o, b1, w2, b2, gamma, beta)   # (n*tb, DIM)
        buf[pl.ds(fill_start * tb, n * tb), :] = y                     # contiguous store
        start += 2 * n
        length = (length + 1) // 2

    o_ref[...] = buf[pl.ds(start * tb, tb), :]   # roots of all tb trees in this block


def tree_fold_pallas_batched(x_blocks, w1_bf, w2_bf, packed, *, n_leaves, tb, num_blocks):
    buf_rows = (2 * n_leaves - 1) * tb
    return pl.pallas_call(
        functools.partial(_tree_fold_batched_kernel, n_leaves, tb),
        out_shape=jax.ShapeDtypeStruct((num_blocks * tb, DIM), jnp.float32),
        grid=(num_blocks,),
        in_specs=[
            pl.BlockSpec((n_leaves * tb, DIM), lambda g: (g, 0)),
            pl.BlockSpec((ARIT * DIM, HIDDEN), lambda g: (0, 0)),
            pl.BlockSpec((HIDDEN, DIM), lambda g: (0, 0)),
            pl.BlockSpec((4, HIDDEN), lambda g: (0, 0)),
        ],
        out_specs=pl.BlockSpec((tb, DIM), lambda g: (g, 0)),
        scratch_shapes=[pltpu.VMEM((buf_rows, DIM), jnp.float32)],
        compiler_params=pltpu.CompilerParams(
            dimension_semantics=("parallel",)),   # v7x: shard tree blocks across both TCs
    )(x_blocks, w1_bf, w2_bf, packed)


# ----------------------------------------------------------------------------- wrappers
def _pack_small_params(b1, b2, gamma, beta):
    """Pack (b1, b2, gamma, beta) into a single (4, HIDDEN) f32 array (one DMA)."""
    pad = jnp.zeros((1, HIDDEN - DIM), jnp.float32)
    return jnp.concatenate(
        [b1,
         jnp.concatenate([b2, pad], axis=1),
         jnp.concatenate([gamma, pad], axis=1),
         jnp.concatenate([beta, pad], axis=1)], axis=0)


@jax.jit
def cat_and_nonlinear_multiary(args, params):
    """Module forward: args (N, DIM) leaf embeddings -> (DIM,) folded root embedding."""
    w1, b1, w2, b2, gamma, beta = params
    packed = _pack_small_params(b1, b2, gamma, beta)
    out = tree_fold_pallas(args.astype(jnp.float32),
                           w1.astype(jnp.bfloat16), w2.astype(jnp.bfloat16), packed)
    return out[0]


@jax.jit
def cat_and_nonlinear_multiary_batched(args_batch, params):
    """args_batch (B, N, DIM) -> (B, DIM): B independent tree folds in one pallas_call."""
    w1, b1, w2, b2, gamma, beta = params
    bsz, n_leaves, _ = args_batch.shape
    tb = TREES_PER_BLOCK
    pad = (-bsz) % tb
    x = args_batch.astype(jnp.float32)
    if pad:
        x = jnp.concatenate([x, jnp.zeros((pad, n_leaves, DIM), jnp.float32)], axis=0)
    num_blocks = (bsz + pad) // tb
    # Rearrange to element-major / tree-minor rows per block: row = g*N*tb + r*tb + t.
    x = x.reshape(num_blocks, tb, n_leaves, DIM)
    x = jnp.swapaxes(x, 1, 2).reshape(num_blocks * n_leaves * tb, DIM)
    packed = _pack_small_params(b1, b2, gamma, beta)
    out = tree_fold_pallas_batched(
        x, w1.astype(jnp.bfloat16), w2.astype(jnp.bfloat16), packed,
        n_leaves=n_leaves, tb=tb, num_blocks=num_blocks)
    return out[:bsz]


# ----------------------------------------------------------------------------- params & reference
def init_params(key):
    """Deterministic init mimicking torch.nn.Linear defaults (U(-1/sqrt(fan_in), ..)).

    Weights stored transposed w.r.t. PyTorch, i.e. (in_features, out_features), f32.
    """
    k1, k2, k3, k4 = jax.random.split(key, 4)
    in1, out1 = ARIT * DIM, HIDDEN
    b1_bound = 1.0 / float(in1) ** 0.5
    w1 = jax.random.uniform(k1, (in1, out1), jnp.float32, -b1_bound, b1_bound)
    b1 = jax.random.uniform(k2, (1, out1), jnp.float32, -b1_bound, b1_bound)
    in2, out2 = HIDDEN, DIM
    b2_bound = 1.0 / float(in2) ** 0.5
    w2 = jax.random.uniform(k3, (in2, out2), jnp.float32, -b2_bound, b2_bound)
    b2 = jax.random.uniform(k4, (1, out2), jnp.float32, -b2_bound, b2_bound)
    gamma = jnp.ones((1, DIM), jnp.float32)    # LayerNorm weight
    beta = jnp.zeros((1, DIM), jnp.float32)    # LayerNorm bias
    return (w1, b1, w2, b2, gamma, beta)


def reference(args, params, bf16_matmul=False):
    """Pure-JAX reference of the same forward pass (for correctness checks)."""
    w1, b1, w2, b2, gamma, beta = params

    def mm(x, w):
        if bf16_matmul:   # matches the kernel's MXU input precision
            return jnp.dot(x.astype(jnp.bfloat16), w.astype(jnp.bfloat16),
                           preferred_element_type=jnp.float32)
        return jnp.dot(x, w, preferred_element_type=jnp.float32,
                       precision=jax.lax.Precision.HIGHEST)

    length = args.shape[0]
    level = args.astype(jnp.float32)
    while length > 1:
        n = length // 2
        x = level[: 2 * n].reshape(n, ARIT * DIM)
        h = jnp.maximum(mm(x, w1) + b1, 0.0)
        y = mm(h, w2) + b2
        mean = y.mean(-1, keepdims=True)
        var = ((y - mean) ** 2).mean(-1, keepdims=True)
        y = (y - mean) / jnp.sqrt(var + LN_EPS) * gamma + beta
        level = jnp.concatenate([level[length - 1:length], y], axis=0) if length % 2 else y
        length = (length + 1) // 2
    return level[0]


if __name__ == "__main__":
    key = jax.random.PRNGKey(0)
    k_a8, k_a7, k_ab, k_params = jax.random.split(key, 4)
    params = init_params(k_params)

    # 1) Module-faithful single-tree fold: 8 leaf embeddings of size DIM.
    args8 = jax.random.normal(k_a8, (8, DIM), dtype=jnp.float32)
    out8 = jax.block_until_ready(cat_and_nonlinear_multiary(args8, params))
    ref8_bf = reference(args8, params, bf16_matmul=True)
    ref8_f32 = reference(args8, params, bf16_matmul=False)
    assert out8.shape == (DIM,)
    assert jnp.allclose(out8, ref8_bf, atol=1e-3, rtol=1e-3), \
        float(jnp.max(jnp.abs(out8 - ref8_bf)))
    assert jnp.allclose(out8, ref8_f32, atol=2e-1, rtol=1e-1), \
        float(jnp.max(jnp.abs(out8 - ref8_f32)))

    # 2) Odd-length carry path (leftover element leads the next level): N = 7.
    args7 = jax.random.normal(k_a7, (7, DIM), dtype=jnp.float32)
    out7 = jax.block_until_ready(cat_and_nonlinear_multiary(args7, params))
    ref7_bf = reference(args7, params, bf16_matmul=True)
    assert jnp.allclose(out7, ref7_bf, atol=1e-3, rtol=1e-3), \
        float(jnp.max(jnp.abs(out7 - ref7_bf)))

    # 3) Batched entry point: 16 independent trees (2 parallel grid blocks of 8).
    args_b = jax.random.normal(k_ab, (16, 8, DIM), dtype=jnp.float32)
    out_b = jax.block_until_ready(cat_and_nonlinear_multiary_batched(args_b, params))
    ref_b = jnp.stack([reference(args_b[i], params, bf16_matmul=True) for i in range(16)])
    assert out_b.shape == (16, DIM)
    assert jnp.allclose(out_b, ref_b, atol=1e-3, rtol=1e-3), \
        float(jnp.max(jnp.abs(out_b - ref_b)))

    print("KERNEL_OK")
</pallas_src>

<mosaic_0001>
module attributes {stable_mosaic.version = 11 : i64} {
  func.func @_tree_fold_kernel(%arg0: memref<8x32xf32, #tpu.memory_space<vmem>>, %arg1: memref<64x64xbf16, #tpu.memory_space<vmem>>, %arg2: memref<64x32xbf16, #tpu.memory_space<vmem>>, %arg3: memref<4x64xf32, #tpu.memory_space<vmem>>, %arg4: memref<1x32xf32, #tpu.memory_space<vmem>>, %arg5: memref<16x32xf32, #tpu.memory_space<vmem>>) attributes {dimension_semantics = [], scalar_prefetch = 0 : i64, scratch_operands = 1 : i64, tpu.core_type = #tpu.core_type<tc>} {
    %c0 = arith.constant 0 : index
    %c0_0 = arith.constant 0 : index
    %0 = vector.load %arg1[%c0, %c0_0] : memref<64x64xbf16, #tpu.memory_space<vmem>>, vector<32x64xbf16>
    %c32 = arith.constant 32 : index
    %c0_1 = arith.constant 0 : index
    %1 = vector.load %arg1[%c32, %c0_1] : memref<64x64xbf16, #tpu.memory_space<vmem>>, vector<32x64xbf16>
    %c0_2 = arith.constant 0 : index
    %c0_3 = arith.constant 0 : index
    %2 = vector.load %arg2[%c0_2, %c0_3] : memref<64x32xbf16, #tpu.memory_space<vmem>>, vector<64x32xbf16>
    %c0_4 = arith.constant 0 : index
    %c0_5 = arith.constant 0 : index
    %3 = vector.load %arg3[%c0_4, %c0_5] : memref<4x64xf32, #tpu.memory_space<vmem>>, vector<1x64xf32>
    %c1 = arith.constant 1 : index
    %c0_6 = arith.constant 0 : index
    %4 = vector.load %arg3[%c1, %c0_6] : memref<4x64xf32, #tpu.memory_space<vmem>>, vector<1x32xf32>
    %c2 = arith.constant 2 : index
    %c0_7 = arith.constant 0 : index
    %5 = vector.load %arg3[%c2, %c0_7] : memref<4x64xf32, #tpu.memory_space<vmem>>, vector<1x32xf32>
    %c3 = arith.constant 3 : index
    %c0_8 = arith.constant 0 : index
    %6 = vector.load %arg3[%c3, %c0_8] : memref<4x64xf32, #tpu.memory_space<vmem>>, vector<1x32xf32>
    %c0_9 = arith.constant 0 : index
    %c0_10 = arith.constant 0 : index
    %7 = vector.load %arg0[%c0_9, %c0_10] : memref<8x32xf32, #tpu.memory_space<vmem>>, vector<8x32xf32>
    %c0_11 = arith.constant 0 : index
    %c0_12 = arith.constant 0 : index
    %8 = vector.load %arg5[%c0_11, %c0_12] : memref<16x32xf32, #tpu.memory_space<vmem>>, vector<8x32xf32>
    tpu.vector_store %arg5[%c0_11, %c0_12], %7 {strides = array<i32>} : memref<16x32xf32, #tpu.memory_space<vmem>>, vector<8x32xf32>,
    %c0_13 = arith.constant 0 : index
    %c0_14 = arith.constant 0 : index
    %9 = tpu.strided_load %arg5[%c0_13, %c0_14] {strides = array<i32: 2, 1>} : memref<16x32xf32, #tpu.memory_space<vmem>>, vector<4x32xf32>
    %c1_15 = arith.constant 1 : index
    %c0_16 = arith.constant 0 : index
    %10 = tpu.strided_load %arg5[%c1_15, %c0_16] {strides = array<i32: 2, 1>} : memref<16x32xf32, #tpu.memory_space<vmem>>, vector<4x32xf32>
    %11 = arith.truncf %9 : vector<4x32xf32> to vector<4x32xbf16>
    %cst = arith.constant dense<0.000000e+00> : vector<4x64xf32>
    %12 = tpu.matmul %11, %0, %cst {dimension_numbers = #tpu.dot_dimension_numbers<[1], [0], [0], [1], [0, 0, 1, 1], [], []>} : vector<4x32xbf16>, vector<32x64xbf16>, vector<4x64xf32> -> vector<4x64xf32>
    %13 = arith.truncf %10 : vector<4x32xf32> to vector<4x32xbf16>
    %cst_17 = arith.constant dense<0.000000e+00> : vector<4x64xf32>
    %14 = tpu.matmul %13, %1, %cst_17 {dimension_numbers = #tpu.dot_dimension_numbers<[1], [0], [0], [1], [0, 0, 1, 1], [], []>} : vector<4x32xbf16>, vector<32x64xbf16>, vector<4x64xf32> -> vector<4x64xf32>
    %15 = arith.addf %12, %14 : vector<4x64xf32>
    %16 = vector.broadcast %3 : vector<1x64xf32> to vector<4x64xf32>
    %17 = arith.addf %15, %16 : vector<4x64xf32>
    %cst_18 = arith.constant 0.000000e+00 : f32
    %18 = vector.broadcast %cst_18 : f32 to vector<4x64xf32>
    %19 = arith.maximumf %17, %18 : vector<4x64xf32>
    %20 = arith.truncf %19 : vector<4x64xf32> to vector<4x64xbf16>
    %cst_19 = arith.constant dense<0.000000e+00> : vector<4x32xf32>
    %21 = tpu.matmul %20, %2, %cst_19 {dimension_numbers = #tpu.dot_dimension_numbers<[1], [0], [0], [1], [0, 0, 1, 1], [], []>} : vector<4x64xbf16>, vector<64x32xbf16>, vector<4x32xf32> -> vector<4x32xf32>
    %22 = vector.broadcast %4 : vector<1x32xf32> to vector<4x32xf32>
    %23 = arith.addf %21, %22 : vector<4x32xf32>
    %cst_20 = arith.constant dense<0.000000e+00> : vector<4xf32>
    %24 = vector.multi_reduction <add>, %23, %cst_20 [1] : vector<4x32xf32> to vector<4xf32>
    %25 = vector.shape_cast %24 : vector<4xf32> to vector<4x1xf32>
    %26 = arith.mulf %23, %23 : vector<4x32xf32>
    %cst_21 = arith.constant dense<0.000000e+00> : vector<4xf32>
    %27 = vector.multi_reduction <add>, %26, %cst_21 [1] : vector<4x32xf32> to vector<4xf32>
    %28 = vector.shape_cast %27 : vector<4xf32> to vector<4x1xf32>
    %cst_22 = arith.constant 3.125000e-02 : f32
    %29 = vector.broadcast %cst_22 : f32 to vector<4x1xf32>
    %30 = arith.mulf %25, %29 : vector<4x1xf32>
    %cst_23 = arith.constant 3.125000e-02 : f32
    %31 = vector.broadcast %cst_23 : f32 to vector<4x1xf32>
    %32 = arith.mulf %28, %31 : vector<4x1xf32>
    %33 = arith.mulf %30, %30 : vector<4x1xf32>
    %34 = arith.subf %32, %33 : vector<4x1xf32>
    %35 = vector.broadcast %30 : vector<4x1xf32> to vector<4x32xf32>
    %36 = arith.subf %23, %35 : vector<4x32xf32>
    %cst_24 = arith.constant 9.99999974E-6 : f32
    %37 = vector.broadcast %cst_24 : f32 to vector<4x1xf32>
    %38 = arith.addf %34, %37 : vector<4x1xf32>
    %39 = math.rsqrt %38 : vector<4x1xf32>
    %40 = vector.broadcast %39 : vector<4x1xf32> to vector<4x32xf32>
    %41 = arith.mulf %36, %40 : vector<4x32xf32>
    %42 = vector.broadcast %5 : vector<1x32xf32> to vector<4x32xf32>
    %43 = arith.mulf %41, %42 : vector<4x32xf32>
    %44 = vector.broadcast %6 : vector<1x32xf32> to vector<4x32xf32>
    %45 = arith.addf %43, %44 : vector<4x32xf32>
    %c8 = arith.constant 8 : index
    %c0_25 = arith.constant 0 : index
    %46 = vector.load %arg5[%c8, %c0_25] : memref<16x32xf32, #tpu.memory_space<vmem>>, vector<4x32xf32>
    tpu.vector_store %arg5[%c8, %c0_25], %45 {strides = array<i32>} : memref<16x32xf32, #tpu.memory_space<vmem>>, vector<4x32xf32>,
    %c8_26 = arith.constant 8 : index
    %c0_27 = arith.constant 0 : index
    %47 = tpu.strided_load %arg5[%c8_26, %c0_27] {strides = array<i32: 2, 1>} : memref<16x32xf32, #tpu.memory_space<vmem>>, vector<2x32xf32>
    %c9 = arith.constant 9 : index
    %c0_28 = arith.constant 0 : index
    %48 = tpu.strided_load %arg5[%c9, %c0_28] {strides = array<i32: 2, 1>} : memref<16x32xf32, #tpu.memory_space<vmem>>, vector<2x32xf32>
    %49 = arith.truncf %47 : vector<2x32xf32> to vector<2x32xbf16>
    %cst_29 = arith.constant dense<0.000000e+00> : vector<2x64xf32>
    %50 = tpu.matmul %49, %0, %cst_29 {dimension_numbers = #tpu.dot_dimension_numbers<[1], [0], [0], [1], [0, 0, 1, 1], [], []>} : vector<2x32xbf16>, vector<32x64xbf16>, vector<2x64xf32> -> vector<2x64xf32>
    %51 = arith.truncf %48 : vector<2x32xf32> to vector<2x32xbf16>
    %cst_30 = arith.constant dense<0.000000e+00> : vector<2x64xf32>
    %52 = tpu.matmul %51, %1, %cst_30 {dimension_numbers = #tpu.dot_dimension_numbers<[1], [0], [0], [1], [0, 0, 1, 1], [], []>} : vector<2x32xbf16>, vector<32x64xbf16>, vector<2x64xf32> -> vector<2x64xf32>
    %53 = arith.addf %50, %52 : vector<2x64xf32>
    %54 = vector.broadcast %3 : vector<1x64xf32> to vector<2x64xf32>
    %55 = arith.addf %53, %54 : vector<2x64xf32>
    %cst_31 = arith.constant 0.000000e+00 : f32
    %56 = vector.broadcast %cst_31 : f32 to vector<2x64xf32>
    %57 = arith.maximumf %55, %56 : vector<2x64xf32>
    %58 = arith.truncf %57 : vector<2x64xf32> to vector<2x64xbf16>
    %cst_32 = arith.constant dense<0.000000e+00> : vector<2x32xf32>
    %59 = tpu.matmul %58, %2, %cst_32 {dimension_numbers = #tpu.dot_dimension_numbers<[1], [0], [0], [1], [0, 0, 1, 1], [], []>} : vector<2x64xbf16>, vector<64x32xbf16>, vector<2x32xf32> -> vector<2x32xf32>
    %60 = vector.broadcast %4 : vector<1x32xf32> to vector<2x32xf32>
    %61 = arith.addf %59, %60 : vector<2x32xf32>
    %cst_33 = arith.constant dense<0.000000e+00> : vector<2xf32>
    %62 = vector.multi_reduction <add>, %61, %cst_33 [1] : vector<2x32xf32> to vector<2xf32>
    %63 = vector.shape_cast %62 : vector<2xf32> to vector<2x1xf32>
    %64 = arith.mulf %61, %61 : vector<2x32xf32>
    %cst_34 = arith.constant dense<0.000000e+00> : vector<2xf32>
    %65 = vector.multi_reduction <add>, %64, %cst_34 [1] : vector<2x32xf32> to vector<2xf32>
    %66 = vector.shape_cast %65 : vector<2xf32> to vector<2x1xf32>
    %cst_35 = arith.constant 3.125000e-02 : f32
    %67 = vector.broadcast %cst_35 : f32 to vector<2x1xf32>
    %68 = arith.mulf %63, %67 : vector<2x1xf32>
    %cst_36 = arith.constant 3.125000e-02 : f32
    %69 = vector.broadcast %cst_36 : f32 to vector<2x1xf32>
    %70 = arith.mulf %66, %69 : vector<2x1xf32>
    %71 = arith.mulf %68, %68 : vector<2x1xf32>
    %72 = arith.subf %70, %71 : vector<2x1xf32>
    %73 = vector.broadcast %68 : vector<2x1xf32> to vector<2x32xf32>
    %74 = arith.subf %61, %73 : vector<2x32xf32>
    %cst_37 = arith.constant 9.99999974E-6 : f32
    %75 = vector.broadcast %cst_37 : f32 to vector<2x1xf32>
    %76 = arith.addf %72, %75 : vector<2x1xf32>
    %77 = math.rsqrt %76 : vector<2x1xf32>
    %78 = vector.broadcast %77 : vector<2x1xf32> to vector<2x32xf32>
    %79 = arith.mulf %74, %78 : vector<2x32xf32>
    %80 = vector.broadcast %5 : vector<1x32xf32> to vector<2x32xf32>
    %81 = arith.mulf %79, %80 : vector<2x32xf32>
    %82 = vector.broadcast %6 : vector<1x32xf32> to vector<2x32xf32>
    %83 = arith.addf %81, %82 : vector<2x32xf32>
    %c12 = arith.constant 12 : index
    %c0_38 = arith.constant 0 : index
    %84 = vector.load %arg5[%c12, %c0_38] : memref<16x32xf32, #tpu.memory_space<vmem>>, vector<2x32xf32>
    tpu.vector_store %arg5[%c12, %c0_38], %83 {strides = array<i32>} : memref<16x32xf32, #tpu.memory_space<vmem>>, vector<2x32xf32>,
    %c12_39 = arith.constant 12 : index
    %c0_40 = arith.constant 0 : index
    %85 = vector.load %arg5[%c12_39, %c0_40] : memref<16x32xf32, #tpu.memory_space<vmem>>, vector<1x32xf32>
    %c13 = arith.constant 13 : index
    %c0_41 = arith.constant 0 : index
    %86 = vector.load %arg5[%c13, %c0_41] : memref<16x32xf32, #tpu.memory_space<vmem>>, vector<1x32xf32>
    %87 = arith.truncf %85 : vector<1x32xf32> to vector<1x32xbf16>
    %cst_42 = arith.constant dense<0.000000e+00> : vector<1x64xf32>
    %88 = tpu.matmul %87, %0, %cst_42 {dimension_numbers = #tpu.dot_dimension_numbers<[1], [0], [0], [1], [0, 0, 1, 1], [], []>} : vector<1x32xbf16>, vector<32x64xbf16>, vector<1x64xf32> -> vector<1x64xf32>
    %89 = arith.truncf %86 : vector<1x32xf32> to vector<1x32xbf16>
    %cst_43 = arith.constant dense<0.000000e+00> : vector<1x64xf32>
    %90 = tpu.matmul %89, %1, %cst_43 {dimension_numbers = #tpu.dot_dimension_numbers<[1], [0], [0], [1], [0, 0, 1, 1], [], []>} : vector<1x32xbf16>, vector<32x64xbf16>, vector<1x64xf32> -> vector<1x64xf32>
    %91 = arith.addf %88, %90 : vector<1x64xf32>
    %92 = arith.addf %91, %3 : vector<1x64xf32>
    %cst_44 = arith.constant 0.000000e+00 : f32
    %93 = vector.broadcast %cst_44 : f32 to vector<1x64xf32>
    %94 = arith.maximumf %92, %93 : vector<1x64xf32>
    %95 = arith.truncf %94 : vector<1x64xf32> to vector<1x64xbf16>
    %cst_45 = arith.constant dense<0.000000e+00> : vector<1x32xf32>
    %96 = tpu.matmul %95, %2, %cst_45 {dimension_numbers = #tpu.dot_dimension_numbers<[1], [0], [0], [1], [0, 0, 1, 1], [], []>} : vector<1x64xbf16>, vector<64x32xbf16>, vector<1x32xf32> -> vector<1x32xf32>
    %97 = arith.addf %96, %4 : vector<1x32xf32>
    %cst_46 = arith.constant dense<0.000000e+00> : vector<1xf32>
    %98 = vector.multi_reduction <add>, %97, %cst_46 [1] : vector<1x32xf32> to vector<1xf32>
    %99 = vector.shape_cast %98 : vector<1xf32> to vector<1x1xf32>
    %100 = arith.mulf %97, %97 : vector<1x32xf32>
    %cst_47 = arith.constant dense<0.000000e+00> : vector<1xf32>
    %101 = vector.multi_reduction <add>, %100, %cst_47 [1] : vector<1x32xf32> to vector<1xf32>
    %102 = vector.shape_cast %101 : vector<1xf32> to vector<1x1xf32>
    %cst_48 = arith.constant 3.125000e-02 : f32
    %103 = vector.broadcast %cst_48 : f32 to vector<1x1xf32>
    %104 = arith.mulf %99, %103 : vector<1x1xf32>
    %cst_49 = arith.constant 3.125000e-02 : f32
    %105 = vector.broadcast %cst_49 : f32 to vector<1x1xf32>
    %106 = arith.mulf %102, %105 : vector<1x1xf32>
    %107 = arith.mulf %104, %104 : vector<1x1xf32>
    %108 = arith.subf %106, %107 : vector<1x1xf32>
    %109 = vector.broadcast %104 : vector<1x1xf32> to vector<1x32xf32>
    %110 = arith.subf %97, %109 : vector<1x32xf32>
    %cst_50 = arith.constant 9.99999974E-6 : f32
    %111 = vector.broadcast %cst_50 : f32 to vector<1x1xf32>
    %112 = arith.addf %108, %111 : vector<1x1xf32>
    %113 = math.rsqrt %112 : vector<1x1xf32>
    %114 = vector.broadcast %113 : vector<1x1xf32> to vector<1x32xf32>
    %115 = arith.mulf %110, %114 : vector<1x32xf32>
    %116 = arith.mulf %115, %5 : vector<1x32xf32>
    %117 = arith.addf %116, %6 : vector<1x32xf32>
    %c14 = arith.constant 14 : index
    %c0_51 = arith.constant 0 : index
    %118 = vector.load %arg5[%c14, %c0_51] : memref<16x32xf32, #tpu.memory_space<vmem>>, vector<1x32xf32>
    tpu.vector_store %arg5[%c14, %c0_51], %117 {strides = array<i32>} : memref<16x32xf32, #tpu.memory_space<vmem>>, vector<1x32xf32>,
    %c14_52 = arith.constant 14 : index
    %c0_53 = arith.constant 0 : index
    %119 = vector.load %arg5[%c14_52, %c0_53] : memref<16x32xf32, #tpu.memory_space<vmem>>, vector<1x32xf32>
    %c0_54 = arith.constant 0 : index
    %c0_55 = arith.constant 0 : index
    %120 = vector.load %arg4[%c0_54, %c0_55] : memref<1x32xf32, #tpu.memory_space<vmem>>, vector<1x32xf32>
    tpu.vector_store %arg4[%c0_54, %c0_55], %119 {strides = array<i32>} : memref<1x32xf32, #tpu.memory_space<vmem>>, vector<1x32xf32>,
    return
  }
}

</mosaic_0001>

<bundles_post_ra>
// kernel: cat_and_nonlinear_multiary.1
= control target key start
LH: loop header
LB: loop body
LE: loop exit
PB: predicated region body
PF: predicated region fallthrough
CT: control target
= control target key end

     0   :  { %v764_v1 = vmov 0.0   ;;  %vm765_vm0 = vmmov 0   ;;  %vm40_vm1 = vcmask 261120   ;;  %s968_s0 = inlined_call_operand.vmem [shape: f32[8,32], index: 0, kind: input, shape index: {}]   ;;  %s969_s1 = inlined_call_operand.vmem [shape: bf16[64,64], index: 1, kind: input, shape index: {}]   ;;  %s970_s2 = inlined_call_operand.vmem [shape: bf16[64,32], index: 2, kind: input, shape index: {}]   ;;  %s971_s3 = inlined_call_operand.vmem [shape: f32[4,64], index: 3, kind: input, shape index: {}]   ;;  %s972_s4 = inlined_call_operand.hbm [shape: f32[1,32], index: 4, kind: output, shape index: {}]  }
   0x1   :  { %v795_v0 = vld [vmem:[%s969_s1 + $0x18] sm:$0xff]   ;;  %641 = vmatprep.subr.bf16.mxu1 %v764_v1  ;;  %v801_v2 = vld [vmem:[%s969_s1 + $0x10] sm:$0xff]   ;;  %657 = vmatprep.subr.bf16.mxu0 %v764_v1  ;;  %v39_v3 = vld [vmem:[%s968_s0] sm:$0xff] }
   0x2   :  { %642 = vmatpush3.bf16.msra.mxu1 %v795_v0  ;;  %645 = vmatprep.mubr.msk.bf16.mxu1 %vm765_vm0, %v764_v1  ;;  %41 = vst.msk [vmem:[#allocation2] sm:$0xff] %vm40_vm1, %v39_v3 }
   0x3   :  { %643 = vmatprep.subr.bf16.mxu1 %v764_v1  ;;  %665 = vmatprep.mubr.msk.bf16.mxu0 %vm765_vm0, %v764_v1 }
   0x6   :  { %644 = vmatpush3.bf16.msra.mxu1 %v801_v2 }
   0x7   :  { %649 = vmatprep.subr.bf16.mxu1 %v764_v1 }
   0x8   :  { %9 = vsyncpa [#allocation4], 0  ;;  %v819_v5 = vld [vmem:[%s969_s1 + $0x8] sm:$0xff]   ;;  %v826_v7 = vld [vmem:[%s969_s1] sm:$0xff]   ;;  %v157_v14 = vlaneseq  ;;  %vm192_vm2 = vcmask 523264   ;;  %vm236_vm3 = vcmask 257024  }
   0x9   :  { %v44_v4 = vld [vmem:[#allocation2 + $0x1] ss:$2 sm:$0xf]  ;;  %v42_v8 = vld [vmem:[#allocation2] ss:$2 sm:$0xf] }
   0xa   :  { %v46_v6 = vpack.c.bf16 %v44_v4, %v44_v4  ;;  %v45_v9 = vpack.c.bf16 %v42_v8, %v42_v8  ;;  %v843_v10 = vld [vmem:[%s970_s2 + $0x18] sm:$0xff]   ;;  %v850_v11 = vld [vmem:[%s970_s2 + $0x10] sm:$0xff]   ;;  %v857_v12 = vld [vmem:[%s970_s2 + $0x8] sm:$0xff]   ;;  %v158_v15 = vshrl.u32 %v157_v14, 7  ;;  %vm401_vm4 = vcmask 254976  }
   0xb   :  { %658 = vmatpush3.bf16.msra.mxu0 %v843_v10  ;;  %v864_v13 = vld [vmem:[%s970_s2] sm:$0xff]   ;;  %vm556_vm5 = vcmask 253952  }
   0xc   :  { %646 = vmatmul.mubr.msk.bf16.vlgmr.msra.gmra.mxu1 %vm40_vm1, %v46_v6  ;;  %659 = vmatprep.subr.bf16.mxu0 %v764_v1  ;;  %v159_v18 = vsub.s32 0, %v158_v15  ;;  %v871_v20 = vld [vmem:[%s971_s3] sm:$0x1]  ;;  %v891_v31 = vld [vmem:[%s971_s3 + $0x1] sm:$0x1] }
   0xd   :  { %650 = vmatpush3.bf16.msra.mxu1 %v819_v5  ;;  %653 = vmatprep.mubr.msk.bf16.mxu1 %vm765_vm0, %v764_v1  ;;  %v902_v48 = vld [vmem:[%s971_s3 + $0x2] sm:$0x1]  ;;  %v907_v49 = vld [vmem:[%s971_s3 + $0x3] sm:$0x1]  ;;  %s766_s3 = smov [#allocation3]  }
   0xe   :  { %651 = vmatprep.subr.bf16.mxu1 %v764_v1  ;;  %v874_v22 = vrot.slane %v871_v20, %v159_v18  ;;  %v894_v32 = vrot.slane %v891_v31, %v159_v18  ;;  %v910_v50 = vrot.slane %v902_v48, %v159_v18  ;;  %v913_v53 = vrot.slane %v907_v49, %v159_v18  ;;  %s583_s12 = sshll.u32 %s766_s3, 4  ;;  %s584_s12 = int_to_ptr.vmem [resolvable:$true] %s583_s12 }
   0xf   :  { %660 = vmatpush3.bf16.msra.mxu0 %v850_v11  ;;  %s742_s13 = scalar_lea.vmem %s584_s12, 16  ;;  %s746_s14 = scalar_lea.vmem %s584_s12, 32 }
  0x10   :  { %661 = vmatprep.subr.bf16.mxu0 %v764_v1  ;;  %p743_p0 = scmp.ne.s32.totalorder %s584_s12, %s742_s13  ;;  %p747_p1 = scmp.lt.s32.totalorder %s584_s12, %s584_s12 }
  0x11   :  { %652 = vmatpush3.bf16.msra.mxu1 %v826_v7  ;;  %p748_p2 = scmp.lt.s32.totalorder %s746_s14, %s742_s13 }
  0x12   :  { %669 = vmatprep.subr.bf16.mxu1 %v764_v1 }
  0x13   :  { %662 = vmatpush3.bf16.msra.mxu0 %v857_v12  ;;  %p749_p3 = por %p748_p2, %p747_p1 }
  0x14   :  { %654 = vmatmul.mubr.msk.bf16.vlgmr.msra.gmra.mxu1 %vm40_vm1, %v45_v9  ;;  %663 = vmatprep.subr.bf16.mxu0 %v764_v1 }
  0x15   :  { %670 = vmatpush3.bf16.msra.mxu1 %v795_v0  ;;  %673 = vmatprep.mubr.msk.bf16.mxu1 %vm765_vm0, %v764_v1  ;;  %p750_p4 = pnand %p749_p3, %p743_p0 }
  0x16   :  { %671 = vmatprep.subr.bf16.mxu1 %v764_v1 }
  0x17   :  { %664 = vmatpush3.bf16.msra.mxu0 %v864_v13 }
  0x18   :  { %685 = vmatprep.subr.bf16.mxu0 %v764_v1 }
  0x19   :  { %672 = vmatpush3.bf16.msra.mxu1 %v801_v2 }
  0x1a   :  { %677 = vmatprep.subr.bf16.mxu1 %v764_v1 }
  0xcc   :  { %v96_v16 = vpop.f32.mrf.mxu1 }
  0xce   :  { %v647_v17 = vpop.f32.mrf.mxu1 }
  0xd0   :  { %v99_v19 = vpop.f32.mrf.mxu1 }
  0xd2   :  { %v648_v21 = vpop.f32.mrf.mxu1 }
  0xd4   :  { %v151_v23 = vpop.f32.mrf.mxu1 }
  0xd5   :  { %v152_v24 = vadd.f32 %v151_v23, %v96_v16 }
  0xd6   :  { %v655_v25 = vpop.f32.mrf.mxu1 }
  0xd7   :  { %v161_v26 = vadd.f32 %v874_v22, %v152_v24 }
  0xd8   :  { %v154_v27 = vpop.f32.mrf.mxu1 }
  0xd9   :  { %v162_v28 = vmax.f32 %v161_v26, 0.0 }
  0xda   :  { %v656_v29 = vpop.f32.mrf.mxu1 }
  0xdb   :  { %v163_v30 = vpack.c.bf16 %v162_v28, %v162_v28 }
  0xdd   :  { %666 = vmatmul.mubr.msk.bf16.vlgmr.msra.gmra.mxu0 %vm192_vm2, %v163_v30 }
  0xde   :  { %686 = vmatpush3.bf16.msra.mxu0 %v843_v10  ;;  %693 = vmatprep.mubr.msk.bf16.mxu0 %vm765_vm0, %v764_v1 }
  0xdf   :  { %687 = vmatprep.subr.bf16.mxu0 %v764_v1 }
  0xe2   :  { %688 = vmatpush3.bf16.msra.mxu0 %v850_v11 }
  0xe3   :  { %689 = vmatprep.subr.bf16.mxu0 %v764_v1 }
  0xe6   :  { %690 = vmatpush3.bf16.msra.mxu0 %v857_v12 }
  0xe7   :  { %691 = vmatprep.subr.bf16.mxu0 %v764_v1 }
  0xea   :  { %692 = vmatpush3.bf16.msra.mxu0 %v864_v13 }
  0xeb   :  { %713 = vmatprep.subr.bf16.mxu0 %v764_v1 }
 0x19d   :  { %v230_v33 = vpop.f32.mrf.mxu0 }
 0x19e   :  { %v231_v34 = vadd.f32 %v230_v33, %v894_v32 }
 0x19f   :  { %v667_v35 = vpop.f32.mrf.mxu0 }
 0x1a0   :  { %v237_v36 = vsel %vm236_vm3, %v231_v34, 0.0  ;;  %v240_v37 = vmul.f32 %v231_v34, %v231_v34 }
 0x1a1   :  { %238 = vadd.xlane.f32.xlu0 %v237_v36  ;;  %v233_v38 = vpop.f32.mrf.mxu0 }
 0x1a2   :  { %v241_v40 = vsel %vm236_vm3, %v240_v37, 0.0 }
 0x1a3   :  { %v668_v39 = vpop.f32.mrf.mxu0 }
 0x1a5   :  { %242 = vadd.xlane.f32.xlu0 %v241_v40 }
 0x22a   :  { %v239_v41 = vpop.xlane.xlu0 %238 }
 0x22b   :  { %v244_v42 = vmul.f32 0.03125, %v239_v41 }
 0x22d   :  { %v246_v44 = vmul.f32 %v244_v42, %v244_v42  ;;  %v248_v51 = vsub.f32 %v231_v34, %v244_v42 }
 0x22e   :  { %v243_v43 = vpop.xlane.xlu0 %242 }
 0x22f   :  { %v245_v45 = vmul.f32 0.03125, %v243_v43 }
 0x231   :  { %v247_v46 = vsub.f32 %v245_v45, %v246_v44 }
 0x233   :  { %v249_v47 = vadd.f32 1e-05, %v247_v46 }
 0x235   :  { %736 = vrsqrt.f32 %v249_v47 }
 0x242   :  { %v737_v52 = vpop.eup %736 }
 0x243   :  { %v251_v54 = vmul.f32 %v737_v52, %v248_v51 }
 0x245   :  { %v256_v55 = vmul.f32 %v910_v50, %v251_v54 }
 0x247   :  { %v261_v56 = vadd.f32 %v913_v53, %v256_v55 }
 0x249   :  { %262 = vst.msk [vmem:[#allocation2 + $0x8] sm:$0xf] %vm236_vm3, %v261_v56 }
 0x250   :  { %v266_v57 = vld [vmem:[#allocation2 + $0x9] ss:$2 sm:$0x3]  ;;  %v264_v59 = vld [vmem:[#allocation2 + $0x8] ss:$2 sm:$0x3] }
 0x251   :  { %v268_v58 = vpack.c.bf16 %v266_v57, %v266_v57  ;;  %v267_v60 = vpack.c.bf16 %v264_v59, %v264_v59 }
 0x253   :  { %674 = vmatmul.mubr.msk.bf16.vlgmr.msra.gmra.mxu1 %vm40_vm1, %v268_v58 }
 0x254   :  { %678 = vmatpush3.bf16.msra.mxu1 %v819_v5  ;;  %681 = vmatprep.mubr.msk.bf16.mxu1 %vm765_vm0, %v764_v1 }
 0x255   :  { %679 = vmatprep.subr.bf16.mxu1 %v764_v1 }
 0x258   :  { %680 = vmatpush3.bf16.msra.mxu1 %v826_v7 }
 0x259   :  { %697 = vmatprep.subr.bf16.mxu1 %v764_v1 }
 0x25b   :  { %682 = vmatmul.mubr.msk.bf16.vlgmr.msra.gmra.mxu1 %vm40_vm1, %v267_v60 }
 0x25c   :  { %698 = vmatpush3.bf16.msra.mxu1 %v795_v0  ;;  %701 = vmatprep.mubr.msk.bf16.mxu1 %vm765_vm0, %v764_v1 }
 0x25d   :  { %699 = vmatprep.subr.bf16.mxu1 %v764_v1 }
 0x260   :  { %700 = vmatpush3.bf16.msra.mxu1 %v801_v2 }
 0x261   :  { %705 = vmatprep.subr.bf16.mxu1 %v764_v1 }
 0x313   :  { %v306_v61 = vpop.f32.mrf.mxu1 }
 0x315   :  { %v675_v62 = vpop.f32.mrf.mxu1 }
 0x317   :  { %v309_v63 = vpop.f32.mrf.mxu1 }
 0x319   :  { %v676_v3 = vpop.f32.mrf.mxu1 }
 0x31b   :  { %v349_v4 = vpop.f32.mrf.mxu1 }
 0x31c   :  { %v350_v6 = vadd.f32 %v349_v4, %v306_v61 }
 0x31d   :  { %v683_v8 = vpop.f32.mrf.mxu1 }
 0x31e   :  { %v355_v9 = vadd.f32 %v350_v6, %v874_v22 }
 0x31f   :  { %v352_v14 = vpop.f32.mrf.mxu1 }
 0x320   :  { %v356_v0 = vmax.f32 %v355_v9, 0.0 }
 0x321   :  { %v684_v15 = vpop.f32.mrf.mxu1 }
 0x322   :  { %v357_v16 = vpack.c.bf16 %v356_v0, %v356_v0 }
 0x324   :  { %694 = vmatmul.mubr.msk.bf16.vlgmr.msra.gmra.mxu0 %vm192_vm2, %v357_v16 }
 0x325   :  { %714 = vmatpush3.bf16.msra.mxu0 %v843_v10  ;;  %721 = vmatprep.mubr.msk.bf16.mxu0 %vm765_vm0, %v764_v1 }
 0x326   :  { %715 = vmatprep.subr.bf16.mxu0 %v764_v1 }
 0x329   :  { %716 = vmatpush3.bf16.msra.mxu0 %v850_v11 }
 0x32a   :  { %717 = vmatprep.subr.bf16.mxu0 %v764_v1 }
 0x32d   :  { %718 = vmatpush3.bf16.msra.mxu0 %v857_v12 }
 0x32e   :  { %719 = vmatprep.subr.bf16.mxu0 %v764_v1 }
 0x331   :  { %720 = vmatpush3.bf16.msra.mxu0 %v864_v13 }
 0x3e4   :  { %v395_v2 = vpop.f32.mrf.mxu0 }
 0x3e5   :  { %v396_v17 = vadd.f32 %v395_v2, %v894_v32 }
 0x3e6   :  { %v695_v10 = vpop.f32.mrf.mxu0 }
 0x3e7   :  { %v402_v18 = vsel %vm401_vm4, %v396_v17, 0.0  ;;  %v405_v19 = vmul.f32 %v396_v17, %v396_v17 }
 0x3e8   :  { %403 = vadd.xlane.f32.xlu1 %v402_v18  ;;  %v398_v21 = vpop.f32.mrf.mxu0 }
 0x3e9   :  { %v406_v11 = vsel %vm401_vm4, %v405_v19, 0.0 }
 0x3ea   :  { %v696_v22 = vpop.f32.mrf.mxu0 }
 0x3ec   :  { %407 = vadd.xlane.f32.xlu1 %v406_v11 }
 0x471   :  { %v404_v23 = vpop.xlane.xlu1 %403 }
 0x472   :  { %v409_v12 = vmul.f32 0.03125, %v404_v23 }
 0x474   :  { %v411_v25 = vmul.f32 %v409_v12, %v409_v12  ;;  %v413_v28 = vsub.f32 %v396_v17, %v409_v12 }
 0x475   :  { %v408_v24 = vpop.xlane.xlu1 %407 }
 0x476   :  { %v410_v26 = vmul.f32 0.03125, %v408_v24 }
 0x478   :  { %v412_v13 = vsub.f32 %v410_v26, %v411_v25 }
 0x47a   :  { %v414_v27 = vadd.f32 1e-05, %v412_v13 }
 0x47c   :  { %738 = vrsqrt.f32 %v414_v27 }
 0x489   :  { %v739_v29 = vpop.eup %738 }
 0x48a   :  { %v416_v30 = vmul.f32 %v739_v29, %v413_v28 }
 0x48c   :  { %v417_v32 = vmul.f32 %v416_v30, %v910_v50 }
 0x48e   :  { %v418_v33 = vadd.f32 %v417_v32, %v913_v53 }
 0x490   :  { %419 = vst.msk [vmem:[#allocation2 + $0xc] sm:$0x3] %vm401_vm4, %v418_v33 }
 0x497   :  { %v421_v34 = vld [vmem:[#allocation2 + $0xd] sm:$0x1]  ;;  %v420_v36 = vld [vmem:[#allocation2 + $0xc] sm:$0x1] }
 0x498   :  { %v423_v35 = vpack.c.bf16 %v421_v34, %v421_v34  ;;  %v422_v37 = vpack.c.bf16 %v420_v36, %v420_v36 }
 0x49a   :  { %702 = vmatmul.mubr.msk.bf16.vlgmr.msra.gmra.mxu1 %vm40_vm1, %v423_v35 }
 0x49b   :  { %706 = vmatpush3.bf16.msra.mxu1 %v819_v5  ;;  %709 = vmatprep.mubr.msk.bf16.mxu1 %vm765_vm0, %v764_v1 }
 0x49c   :  { %707 = vmatprep.subr.bf16.mxu1 %v764_v1 }
 0x49f   :  { %708 = vmatpush3.bf16.msra.mxu1 %v826_v7 }
 0x4a2   :  { %710 = vmatmul.mubr.msk.bf16.vlgmr.msra.gmra.mxu1 %vm40_vm1, %v422_v37 }
 0x55a   :  { %v461_v38 = vpop.f32.mrf.mxu1 }
 0x55c   :  { %v703_v39 = vpop.f32.mrf.mxu1 }
 0x55e   :  { %v464_v40 = vpop.f32.mrf.mxu1 }
 0x560   :  { %v704_v41 = vpop.f32.mrf.mxu1 }
 0x562   :  { %v504_v42 = vpop.f32.mrf.mxu1 }
 0x563   :  { %v505_v43 = vadd.f32 %v504_v42, %v461_v38 }
 0x564   :  { %v711_v44 = vpop.f32.mrf.mxu1 }
 0x565   :  { %v510_v5 = vadd.f32 %v505_v43, %v871_v20 }
 0x566   :  { %v507_v45 = vpop.f32.mrf.mxu1 }
 0x567   :  { %v511_v46 = vmax.f32 %v510_v5, 0.0 }
 0x568   :  { %v712_v47 = vpop.f32.mrf.mxu1 }
 0x569   :  { %v512_v50 = vpack.c.bf16 %v511_v46, %v511_v46 }
 0x56b   :  { %722 = vmatmul.mubr.msk.bf16.vlgmr.msra.gmra.mxu0 %vm192_vm2, %v512_v50 }
 0x62b   :  { %v550_v1 = vpop.f32.mrf.mxu0 }
 0x62c   :  { %v551_v7 = vadd.f32 %v550_v1, %v891_v31 }
 0x62d   :  { %v723_v51 = vpop.f32.mrf.mxu0 }
 0x62e   :  { %v557_v52 = vsel %vm556_vm5, %v551_v7, 0.0  ;;  %v560_v53 = vmul.f32 %v551_v7, %v551_v7 }
 0x62f   :  { %558 = vadd.xlane.f32.xlu0 %v557_v52  ;;  %v553_v54 = vpop.f32.mrf.mxu0 }
 0x630   :  { %v561_v55 = vsel %vm556_vm5, %v560_v53, 0.0 }
 0x631   :  { %562 = vadd.xlane.f32.xlu1 %v561_v55  ;;  %v724_v20 = vpop.f32.mrf.mxu0 }
 0x6b8   :  { %v559_v56 = vpop.xlane.xlu0 %558 }
 0x6b9   :  { %v564_v57 = vmul.f32 0.03125, %v559_v56 }
 0x6ba   :  { %v563_v58 = vpop.xlane.xlu1 %562 }
 0x6bb   :  { %v566_v59 = vmul.f32 %v564_v57, %v564_v57  ;;  %v565_v60 = vmul.f32 0.03125, %v563_v58  ;;  %v568_v63 = vsub.f32 %v551_v7, %v564_v57 }
 0x6bd   :  { %v567_v61 = vsub.f32 %v565_v60, %v566_v59 }
 0x6bf   :  { %v569_v62 = vadd.f32 1e-05, %v567_v61 }
 0x6c1   :  { %740 = vrsqrt.f32 %v569_v62 }
 0x6ce   :  { %v741_v31 = vpop.eup %740 }
 0x6cf   :  { %v571_v3 = vmul.f32 %v741_v31, %v568_v63 }
 0x6d1   :  { %v572_v4 = vmul.f32 %v571_v3, %v902_v48 }
 0x6d3   :  { %v573_v6 = vadd.f32 %v572_v4, %v907_v49 }
 0x6d5   :  { %574 = vst.msk [vmem:[#allocation2 + $0xe] sm:$0x1] %vm556_vm5, %v573_v6 }
 0x6dc   :  { %v575_v8 = vld [vmem:[#allocation2 + $0xe] sm:$0x1] }
 0x6dd   :  { %576 = vst.msk [vmem:[#allocation3] sm:$0x1] %vm556_vm5, %v575_v8 }
 0x6de   :  { %753 = shalt.err (!%p750_p4)
}
 0x6df   :  { %586 = dma.vmem_to_hbm [thread:$0]  %s584_s12, 16, %s972_s4, [#allocation4]  }
 0x6e0   :  { %762 = dma.done.wait [#allocation4], 16  }
 0x6e1   :  { %763 = vsyncadd [#allocation4], 4294967280 }
 0x6e2   :  { %590 = vsyncpa [#allocation4], 1 }

</bundles_post_ra>
